<compile_context>
chip_gen: v7x
topology: tpu7x:2x2x1
jax: 0.10.0
libtpu: 0.0.40
codegen_flags: <defaults>
</compile_context>

<pallas_src>
import functools

import jax
import jax.numpy as jnp
from jax.experimental import pallas as pl
from jax.experimental.pallas import tpu as pltpu


# ----------------------------------------------------------------------------
# Kernel 1: group-norm statistics -> per-channel scale / shift
# ----------------------------------------------------------------------------
def _stats_kernel(f_ref, gmap_ref, gmapt_ref, gamma_ref, beta_ref,
                  scale_ref, shift_ref, s1_ref, s2_ref, *, eps, inv_count):
    # f_ref   : (Cf, T)  one spatial tile of one image, NCHW-flat (HW on lanes)
    # gmap    : (Cf, G) one-hot channel->group ; gmapt : (G, Cf)
    # gamma/beta : (Cf, 1)
    # outputs : scale/shift (Cf, 1) per image
    k = pl.program_id(1)

    @pl.when(k == 0)
    def _():
        s1_ref[...] = jnp.zeros_like(s1_ref)
        s2_ref[...] = jnp.zeros_like(s2_ref)

    x = f_ref[...].astype(jnp.float32)                                  # (Cf, T)
    s1_ref[...] += jnp.sum(x, axis=1, keepdims=True)                    # (Cf, 1)
    s2_ref[...] += jnp.sum(x * x, axis=1, keepdims=True)                # (Cf, 1)

    @pl.when(k == pl.num_programs(1) - 1)
    def _():
        gmapt = gmapt_ref[...]                                          # (G, Cf)
        mean_g = jnp.dot(gmapt, s1_ref[...],
                         preferred_element_type=jnp.float32) * inv_count   # (G, 1)
        ex2_g = jnp.dot(gmapt, s2_ref[...],
                        preferred_element_type=jnp.float32) * inv_count    # (G, 1)
        var_g = jnp.maximum(ex2_g - mean_g * mean_g, 0.0)               # clamp
        rstd_g = jax.lax.rsqrt(var_g + eps)

        gmap = gmap_ref[...]                                            # (Cf, G)
        mean_c = jnp.dot(gmap, mean_g, preferred_element_type=jnp.float32)  # (Cf, 1)
        rstd_c = jnp.dot(gmap, rstd_g, preferred_element_type=jnp.float32)  # (Cf, 1)

        scale = rstd_c * gamma_ref[...]
        shift = beta_ref[...] - mean_c * scale
        scale_ref[...] = scale
        shift_ref[...] = shift


# ----------------------------------------------------------------------------
# Kernel 2: normalize + fused 1x1 convs + modulate, spatially tiled
# ----------------------------------------------------------------------------
def _apply_kernel(f_ref, zq_ref, scale_ref, shift_ref, w_ref, bias_ref, o_ref, *, cf):
    # f_ref  : (Cf, T)   zq_ref : (Cz, T)
    # scale/shift : (Cf, 1) ; w_ref : (2*Cf, Cz) ; bias_ref : (2*Cf, 1)
    x = f_ref[...].astype(jnp.float32)                                   # (Cf, T)
    z = zq_ref[...].astype(jnp.float32)                                  # (Cz, T)

    # both 1x1 convs in a single MXU push (weights stacked on the M axis)
    yb = jnp.dot(w_ref[...], z, preferred_element_type=jnp.float32) + bias_ref[...]
    y = yb[:cf, :]                                                       # conv_y(zq)
    b = yb[cf:, :]                                                       # conv_b(zq)

    norm = x * scale_ref[...] + shift_ref[...]                           # folded GN
    o_ref[...] = (norm * y + b).astype(o_ref.dtype)


def _pick_spatial_tile(hw, cap=2048):
    """Largest multiple-of-128 divisor of hw that is <= cap, else full extent."""
    if hw <= cap:
        return hw
    t = cap - cap % 128
    while t >= 128:
        if hw % t == 0:
            return t
        t -= 128
    return hw


def spatial_norm_2d(f, zq, gamma, beta, wy, by, wb, bb, *, num_groups=32, eps=1e-6):
    """SpatialNorm2D forward: f (N,Cf,H,W), zq (N,Cz,Hz,Wz) -> (N,Cf,H,W)."""
    N, Cf, H, W = f.shape
    Nz, Cz, Hz, Wz = zq.shape
    assert N == Nz and Cf % num_groups == 0
    G = num_groups
    Cg = Cf // G
    HW = H * W

    # --- layout glue (cheap): nearest resize of zq via index gather, no transposes ---
    hi = (jnp.arange(H) * Hz) // H
    wi = (jnp.arange(W) * Wz) // W
    zq_up = zq[:, :, hi, :][:, :, :, wi].reshape(N, Cz, HW)              # (N, Cz, HW)
    f_flat = f.reshape(N, Cf, HW)                                        # (N, Cf, HW)

    T = _pick_spatial_tile(HW)
    nT = HW // T

    # one-hot channel->group map (tiny constants, stay resident)
    gmap = (jnp.arange(Cf)[:, None] // Cg == jnp.arange(G)[None, :]).astype(jnp.float32)
    gmap_t = gmap.T
    gamma_col = gamma.astype(jnp.float32).reshape(Cf, 1)
    beta_col = beta.astype(jnp.float32).reshape(Cf, 1)

    vmem_limit = 64 * 1024 * 1024  # tiles are small; plenty of headroom everywhere

    # ---------------- pass 1: group-norm stats -> per-channel scale/shift ----------------
    stats_kernel = functools.partial(_stats_kernel, eps=float(eps),
                                     inv_count=1.0 / float(HW * Cg))
    scale_c, shift_c = pl.pallas_call(
        stats_kernel,
        out_shape=(jax.ShapeDtypeStruct((N, Cf, 1), jnp.float32),
                   jax.ShapeDtypeStruct((N, Cf, 1), jnp.float32)),
        grid=(N, nT),
        in_specs=[
            pl.BlockSpec((None, Cf, T), lambda n, k: (n, 0, k)),         # f tile
            pl.BlockSpec((Cf, G), lambda n, k: (0, 0)),                  # group map
            pl.BlockSpec((G, Cf), lambda n, k: (0, 0)),                  # group map^T
            pl.BlockSpec((Cf, 1), lambda n, k: (0, 0)),                  # gamma
            pl.BlockSpec((Cf, 1), lambda n, k: (0, 0)),                  # beta
        ],
        out_specs=(pl.BlockSpec((None, Cf, 1), lambda n, k: (n, 0, 0)),
                   pl.BlockSpec((None, Cf, 1), lambda n, k: (n, 0, 0))),
        scratch_shapes=[pltpu.VMEM((Cf, 1), jnp.float32),                # sum(x)
                        pltpu.VMEM((Cf, 1), jnp.float32)],               # sum(x^2)
        compiler_params=pltpu.CompilerParams(
            dimension_semantics=("parallel", "arbitrary"),
            vmem_limit_bytes=vmem_limit),
    )(f_flat, gmap, gmap_t, gamma_col, beta_col)

    # ---------------- pass 2: normalize + fused convs + modulate ----------------
    w_cat = jnp.concatenate([wy, wb], axis=0).astype(jnp.float32)        # (2*Cf, Cz)
    bias_cat = jnp.concatenate([by, bb], axis=0).astype(jnp.float32).reshape(2 * Cf, 1)

    apply_kernel = functools.partial(_apply_kernel, cf=Cf)
    out = pl.pallas_call(
        apply_kernel,
        out_shape=jax.ShapeDtypeStruct((N, Cf, HW), f.dtype),
        grid=(N, nT),
        in_specs=[
            pl.BlockSpec((None, Cf, T), lambda n, k: (n, 0, k)),         # f tile
            pl.BlockSpec((None, Cz, T), lambda n, k: (n, 0, k)),         # resized zq tile
            pl.BlockSpec((None, Cf, 1), lambda n, k: (n, 0, 0)),         # scale (resident)
            pl.BlockSpec((None, Cf, 1), lambda n, k: (n, 0, 0)),         # shift (resident)
            pl.BlockSpec((2 * Cf, Cz), lambda n, k: (0, 0)),             # fused conv weights
            pl.BlockSpec((2 * Cf, 1), lambda n, k: (0, 0)),              # fused conv biases
        ],
        out_specs=pl.BlockSpec((None, Cf, T), lambda n, k: (n, 0, k)),
        compiler_params=pltpu.CompilerParams(
            dimension_semantics=("parallel", "parallel"),
            vmem_limit_bytes=vmem_limit),
    )(f_flat, zq_up, scale_c, shift_c, w_cat, bias_cat)

    return out.reshape(N, Cf, H, W)                                      # still NCHW


class SpatialNorm2D:
    """JAX/Pallas port of the PyTorch SpatialNorm2D module."""

    def __init__(self, f_channels, zq_channels, key=None, num_groups=32, eps=1e-6):
        assert f_channels % num_groups == 0
        key = jax.random.PRNGKey(0) if key is None else key
        k1, k2, k3, k4, k5, k6 = jax.random.split(key, 6)
        bound = 1.0 / (zq_channels ** 0.5)          # PyTorch Conv2d(k=1) uniform bound
        self.wy = jax.random.uniform(k1, (f_channels, zq_channels), jnp.float32, -bound, bound)
        self.by = jax.random.uniform(k2, (f_channels,), jnp.float32, -bound, bound)
        self.wb = jax.random.uniform(k3, (f_channels, zq_channels), jnp.float32, -bound, bound)
        self.bb = jax.random.uniform(k4, (f_channels,), jnp.float32, -bound, bound)
        # GroupNorm affine params (PyTorch default is ones/zeros; perturb to exercise them)
        self.gamma = 1.0 + 0.1 * jax.random.normal(k5, (f_channels,), jnp.float32)
        self.beta = 0.1 * jax.random.normal(k6, (f_channels,), jnp.float32)
        self.num_groups = num_groups
        self.eps = eps

    def __call__(self, f, zq):
        return spatial_norm_2d(f, zq, self.gamma, self.beta,
                               self.wy, self.by, self.wb, self.bb,
                               num_groups=self.num_groups, eps=self.eps)


def _ref_spatial_norm(f, zq, gamma, beta, wy, by, wb, bb, num_groups=32, eps=1e-6):
    """Pure-JAX reference matching the PyTorch forward."""
    N, Cf, H, W = f.shape
    Hz, Wz = zq.shape[-2:]
    hi = (jnp.arange(H) * Hz) // H
    wi = (jnp.arange(W) * Wz) // W
    zq_up = zq[:, :, hi, :][:, :, :, wi]
    xg = f.astype(jnp.float32).reshape(N, num_groups, Cf // num_groups, H, W)
    mean = xg.mean(axis=(2, 3, 4), keepdims=True)
    var = ((xg - mean) ** 2).mean(axis=(2, 3, 4), keepdims=True)
    norm = ((xg - mean) * jax.lax.rsqrt(var + eps)).reshape(N, Cf, H, W)
    norm = norm * gamma[None, :, None, None] + beta[None, :, None, None]
    y = jnp.einsum('nchw,oc->nohw', zq_up, wy) + by[None, :, None, None]
    b = jnp.einsum('nchw,oc->nohw', zq_up, wb) + bb[None, :, None, None]
    return (norm * y + b).astype(f.dtype)


if __name__ == "__main__":
    key = jax.random.PRNGKey(0)
    kf, kz, kz2, km = jax.random.split(key, 4)

    f_channels, zq_channels = 64, 4
    mod = SpatialNorm2D(f_channels, zq_channels, key=km)

    # f: (B, Cf, H, W); zq at half resolution -> nearest upsample path
    f = jax.random.normal(kf, (2, f_channels, 16, 16), dtype=jnp.float32)
    zq = jax.random.normal(kz, (2, zq_channels, 8, 8), dtype=jnp.float32)
    out = jax.block_until_ready(mod(f, zq))
    ref = _ref_spatial_norm(f, zq, mod.gamma, mod.beta, mod.wy, mod.by, mod.wb, mod.bb)
    assert out.shape == (2, f_channels, 16, 16), out.shape
    assert jnp.allclose(out, ref, atol=1e-4, rtol=1e-4), float(jnp.max(jnp.abs(out - ref)))

    # zq already at f's resolution -> identity resize path
    zq_same = jax.random.normal(kz2, (2, zq_channels, 16, 16), dtype=jnp.float32)
    out2 = jax.block_until_ready(mod(f, zq_same))
    ref2 = _ref_spatial_norm(f, zq_same, mod.gamma, mod.beta, mod.wy, mod.by, mod.wb, mod.bb)
    assert out2.shape == (2, f_channels, 16, 16), out2.shape
    assert jnp.allclose(out2, ref2, atol=1e-4, rtol=1e-4), float(jnp.max(jnp.abs(out2 - ref2)))

    print("KERNEL_OK")
</pallas_src>

<mosaic_0001>
module attributes {stable_mosaic.version = 11 : i64} {
  func.func @_stats_kernel(%arg0: i32, %arg1: i32, %arg2: memref<1x64x256xf32, #tpu.memory_space<vmem>>, %arg3: memref<64x32xf32, #tpu.memory_space<vmem>>, %arg4: memref<32x64xf32, #tpu.memory_space<vmem>>, %arg5: memref<64x1xf32, #tpu.memory_space<vmem>>, %arg6: memref<64x1xf32, #tpu.memory_space<vmem>>, %arg7: memref<1x64x1xf32, #tpu.memory_space<vmem>>, %arg8: memref<1x64x1xf32, #tpu.memory_space<vmem>>, %arg9: memref<64x1xf32, #tpu.memory_space<vmem>>, %arg10: memref<64x1xf32, #tpu.memory_space<vmem>>) attributes {dimension_semantics = [#tpu.dimension_semantics<parallel>, #tpu.dimension_semantics<arbitrary>], iteration_bounds = array<i64: 2, 1>, scalar_prefetch = 0 : i64, scratch_operands = 2 : i64, tpu.core_type = #tpu.core_type<tc>, window_params = [{transform_indices = @transform_0, window_bounds = array<i64: 1, 64, 256>}, {pipeline_mode = #tpu.pipeline_mode<synchronous>, transform_indices = @transform_1, window_bounds = array<i64: 64, 32>}, {pipeline_mode = #tpu.pipeline_mode<synchronous>, transform_indices = @transform_2, window_bounds = array<i64: 32, 64>}, {pipeline_mode = #tpu.pipeline_mode<synchronous>, transform_indices = @transform_3, window_bounds = array<i64: 64, 1>}, {pipeline_mode = #tpu.pipeline_mode<synchronous>, transform_indices = @transform_4, window_bounds = array<i64: 64, 1>}, {transform_indices = @transform_5, window_bounds = array<i64: 1, 64, 1>}, {transform_indices = @transform_6, window_bounds = array<i64: 1, 64, 1>}]} {
    %c0_i32 = arith.constant 0 : i32
    %0 = arith.cmpi eq, %arg1, %c0_i32 : i32
    %1 = arith.extui %0 : i1 to i32
    %c0_i32_0 = arith.constant 0 : i32
    %2 = arith.cmpi ne, %1, %c0_i32_0 : i32
    scf.if %2 {
      %cst_14 = arith.constant 0.000000e+00 : f32
      %19 = vector.broadcast %cst_14 : f32 to vector<64x1xf32>
      %c0_15 = arith.constant 0 : index
      %c0_16 = arith.constant 0 : index
      %20 = vector.load %arg9[%c0_15, %c0_16] : memref<64x1xf32, #tpu.memory_space<vmem>>, vector<64x1xf32>
      tpu.vector_store %arg9[%c0_15, %c0_16], %19 {strides = array<i32>} : memref<64x1xf32, #tpu.memory_space<vmem>>, vector<64x1xf32>,
      %cst_17 = arith.constant 0.000000e+00 : f32
      %21 = vector.broadcast %cst_17 : f32 to vector<64x1xf32>
      %c0_18 = arith.constant 0 : index
      %c0_19 = arith.constant 0 : index
      %22 = vector.load %arg10[%c0_18, %c0_19] : memref<64x1xf32, #tpu.memory_space<vmem>>, vector<64x1xf32>
      tpu.vector_store %arg10[%c0_18, %c0_19], %21 {strides = array<i32>} : memref<64x1xf32, #tpu.memory_space<vmem>>, vector<64x1xf32>,
    } else {
    }
    %c0 = arith.constant 0 : index
    %c0_1 = arith.constant 0 : index
    %c0_2 = arith.constant 0 : index
    %3 = vector.load %arg2[%c0, %c0_1, %c0_2] : memref<1x64x256xf32, #tpu.memory_space<vmem>>, vector<1x64x256xf32>
    %4 = vector.shape_cast %3 : vector<1x64x256xf32> to vector<64x256xf32>
    %c0_3 = arith.constant 0 : index
    %c0_4 = arith.constant 0 : index
    %5 = vector.load %arg9[%c0_3, %c0_4] : memref<64x1xf32, #tpu.memory_space<vmem>>, vector<64x1xf32>
    %cst = arith.constant dense<0.000000e+00> : vector<64xf32>
    %6 = vector.multi_reduction <add>, %4, %cst [1] : vector<64x256xf32> to vector<64xf32>
    %7 = vector.shape_cast %6 : vector<64xf32> to vector<64x1xf32>
    %8 = arith.addf %5, %7 : vector<64x1xf32>
    %c0_5 = arith.constant 0 : index
    %c0_6 = arith.constant 0 : index
    %9 = vector.load %arg9[%c0_5, %c0_6] : memref<64x1xf32, #tpu.memory_space<vmem>>, vector<64x1xf32>
    tpu.vector_store %arg9[%c0_5, %c0_6], %8 {strides = array<i32>} : memref<64x1xf32, #tpu.memory_space<vmem>>, vector<64x1xf32>,
    %c0_7 = arith.constant 0 : index
    %c0_8 = arith.constant 0 : index
    %10 = vector.load %arg10[%c0_7, %c0_8] : memref<64x1xf32, #tpu.memory_space<vmem>>, vector<64x1xf32>
    %11 = arith.mulf %4, %4 : vector<64x256xf32>
    %cst_9 = arith.constant dense<0.000000e+00> : vector<64xf32>
    %12 = vector.multi_reduction <add>, %11, %cst_9 [1] : vector<64x256xf32> to vector<64xf32>
    %13 = vector.shape_cast %12 : vector<64xf32> to vector<64x1xf32>
    %14 = arith.addf %10, %13 : vector<64x1xf32>
    %c0_10 = arith.constant 0 : index
    %c0_11 = arith.constant 0 : index
    %15 = vector.load %arg10[%c0_10, %c0_11] : memref<64x1xf32, #tpu.memory_space<vmem>>, vector<64x1xf32>
    tpu.vector_store %arg10[%c0_10, %c0_11], %14 {strides = array<i32>} : memref<64x1xf32, #tpu.memory_space<vmem>>, vector<64x1xf32>,
    %c0_i32_12 = arith.constant 0 : i32
    %16 = arith.cmpi eq, %arg1, %c0_i32_12 : i32
    %17 = arith.extui %16 : i1 to i32
    %c0_i32_13 = arith.constant 0 : i32
    %18 = arith.cmpi ne, %17, %c0_i32_13 : i32
    scf.if %18 {
      %c0_14 = arith.constant 0 : index
      %c0_15 = arith.constant 0 : index
      %19 = vector.load %arg4[%c0_14, %c0_15] : memref<32x64xf32, #tpu.memory_space<vmem>>, vector<32x64xf32>
      %c0_16 = arith.constant 0 : index
      %c0_17 = arith.constant 0 : index
      %20 = vector.load %arg9[%c0_16, %c0_17] : memref<64x1xf32, #tpu.memory_space<vmem>>, vector<64x1xf32>
      %cst_18 = arith.constant dense<0.000000e+00> : vector<32x1xf32>
      %21 = tpu.matmul %19, %20, %cst_18 {dimension_numbers = #tpu.dot_dimension_numbers<[1], [0], [0], [1], [0, 0, 1, 1], [], []>} : vector<32x64xf32>, vector<64x1xf32>, vector<32x1xf32> -> vector<32x1xf32>
      %cst_19 = arith.constant 0.001953125 : f32
      %22 = vector.broadcast %cst_19 : f32 to vector<32x1xf32>
      %23 = arith.mulf %21, %22 : vector<32x1xf32>
      %c0_20 = arith.constant 0 : index
      %c0_21 = arith.constant 0 : index
      %24 = vector.load %arg10[%c0_20, %c0_21] : memref<64x1xf32, #tpu.memory_space<vmem>>, vector<64x1xf32>
      %cst_22 = arith.constant dense<0.000000e+00> : vector<32x1xf32>
      %25 = tpu.matmul %19, %24, %cst_22 {dimension_numbers = #tpu.dot_dimension_numbers<[1], [0], [0], [1], [0, 0, 1, 1], [], []>} : vector<32x64xf32>, vector<64x1xf32>, vector<32x1xf32> -> vector<32x1xf32>
      %cst_23 = arith.constant 0.001953125 : f32
      %26 = vector.broadcast %cst_23 : f32 to vector<32x1xf32>
      %27 = arith.mulf %25, %26 : vector<32x1xf32>
      %28 = arith.mulf %23, %23 : vector<32x1xf32>
      %29 = arith.subf %27, %28 : vector<32x1xf32>
      %cst_24 = arith.constant 0.000000e+00 : f32
      %30 = vector.broadcast %cst_24 : f32 to vector<32x1xf32>
      %31 = arith.maximumf %29, %30 : vector<32x1xf32>
      %cst_25 = arith.constant 9.99999997E-7 : f32
      %32 = vector.broadcast %cst_25 : f32 to vector<32x1xf32>
      %33 = arith.addf %31, %32 : vector<32x1xf32>
      %34 = math.rsqrt %33 : vector<32x1xf32>
      %c0_26 = arith.constant 0 : index
      %c0_27 = arith.constant 0 : index
      %35 = vector.load %arg3[%c0_26, %c0_27] : memref<64x32xf32, #tpu.memory_space<vmem>>, vector<64x32xf32>
      %cst_28 = arith.constant dense<0.000000e+00> : vector<64x1xf32>
      %36 = tpu.matmul %35, %23, %cst_28 {dimension_numbers = #tpu.dot_dimension_numbers<[1], [0], [0], [1], [0, 0, 1, 1], [], []>} : vector<64x32xf32>, vector<32x1xf32>, vector<64x1xf32> -> vector<64x1xf32>
      %cst_29 = arith.constant dense<0.000000e+00> : vector<64x1xf32>
      %37 = tpu.matmul %35, %34, %cst_29 {dimension_numbers = #tpu.dot_dimension_numbers<[1], [0], [0], [1], [0, 0, 1, 1], [], []>} : vector<64x32xf32>, vector<32x1xf32>, vector<64x1xf32> -> vector<64x1xf32>
      %c0_30 = arith.constant 0 : index
      %c0_31 = arith.constant 0 : index
      %38 = vector.load %arg5[%c0_30, %c0_31] : memref<64x1xf32, #tpu.memory_space<vmem>>, vector<64x1xf32>
      %39 = arith.mulf %37, %38 : vector<64x1xf32>
      %c0_32 = arith.constant 0 : index
      %c0_33 = arith.constant 0 : index
      %40 = vector.load %arg6[%c0_32, %c0_33] : memref<64x1xf32, #tpu.memory_space<vmem>>, vector<64x1xf32>
      %41 = arith.mulf %36, %39 : vector<64x1xf32>
      %42 = arith.subf %40, %41 : vector<64x1xf32>
      %c0_34 = arith.constant 0 : index
      %c0_35 = arith.constant 0 : index
      %c0_36 = arith.constant 0 : index
      %43 = vector.load %arg7[%c0_34, %c0_35, %c0_36] : memref<1x64x1xf32, #tpu.memory_space<vmem>>, vector<1x64x1xf32>
      %44 = vector.shape_cast %43 : vector<1x64x1xf32> to vector<64x1xf32>
      %45 = vector.shape_cast %39 : vector<64x1xf32> to vector<1x64x1xf32>
      tpu.vector_store %arg7[%c0_34, %c0_35, %c0_36], %45 {strides = array<i32>} : memref<1x64x1xf32, #tpu.memory_space<vmem>>, vector<1x64x1xf32>,
      %c0_37 = arith.constant 0 : index
      %c0_38 = arith.constant 0 : index
      %c0_39 = arith.constant 0 : index
      %46 = vector.load %arg8[%c0_37, %c0_38, %c0_39] : memref<1x64x1xf32, #tpu.memory_space<vmem>>, vector<1x64x1xf32>
      %47 = vector.shape_cast %46 : vector<1x64x1xf32> to vector<64x1xf32>
      %48 = vector.shape_cast %42 : vector<64x1xf32> to vector<1x64x1xf32>
      tpu.vector_store %arg8[%c0_37, %c0_38, %c0_39], %48 {strides = array<i32>} : memref<1x64x1xf32, #tpu.memory_space<vmem>>, vector<1x64x1xf32>,
    } else {
    }
    return
  }
  func.func @transform_0(%arg0: i32, %arg1: i32) -> (i32, i32, i32) {
    %c0_i32 = arith.constant 0 : i32
    %c0_i32_0 = arith.constant 0 : i32
    return %arg0, %c0_i32, %arg1 : i32, i32, i32
  }
  func.func @transform_1(%arg0: i32, %arg1: i32) -> (i32, i32) {
    %c0_i32 = arith.constant 0 : i32
    %c0_i32_0 = arith.constant 0 : i32
    %c0_i32_1 = arith.constant 0 : i32
    return %c0_i32, %c0_i32_0 : i32, i32
  }
  func.func @transform_2(%arg0: i32, %arg1: i32) -> (i32, i32) {
    %c0_i32 = arith.constant 0 : i32
    %c0_i32_0 = arith.constant 0 : i32
    %c0_i32_1 = arith.constant 0 : i32
    return %c0_i32, %c0_i32_0 : i32, i32
  }
  func.func @transform_3(%arg0: i32, %arg1: i32) -> (i32, i32) {
    %c0_i32 = arith.constant 0 : i32
    %c0_i32_0 = arith.constant 0 : i32
    %c0_i32_1 = arith.constant 0 : i32
    return %c0_i32, %c0_i32_0 : i32, i32
  }
  func.func @transform_4(%arg0: i32, %arg1: i32) -> (i32, i32) {
    %c0_i32 = arith.constant 0 : i32
    %c0_i32_0 = arith.constant 0 : i32
    %c0_i32_1 = arith.constant 0 : i32
    return %c0_i32, %c0_i32_0 : i32, i32
  }
  func.func @transform_5(%arg0: i32, %arg1: i32) -> (i32, i32, i32) {
    %c0_i32 = arith.constant 0 : i32
    %c0_i32_0 = arith.constant 0 : i32
    %c0_i32_1 = arith.constant 0 : i32
    return %arg0, %c0_i32, %c0_i32_0 : i32, i32, i32
  }
  func.func @transform_6(%arg0: i32, %arg1: i32) -> (i32, i32, i32) {
    %c0_i32 = arith.constant 0 : i32
    %c0_i32_0 = arith.constant 0 : i32
    %c0_i32_1 = arith.constant 0 : i32
    return %arg0, %c0_i32, %c0_i32_0 : i32, i32, i32
  }
}

</mosaic_0001>

<bundles_post_ra>
// kernel: tpu_custom_call.1
= control target key start
LH: loop header
LB: loop body
LE: loop exit
PB: predicated region body
PF: predicated region fallthrough
CT: control target
= control target key end

     0   :  { %s2372_s0 = inlined_call_operand.hbm [shape: f32[2,64,256], index: 0, kind: input, shape index: {}]   ;;  %s2373_s1 = inlined_call_operand.hbm [shape: f32[64,32], index: 1, kind: input, shape index: {}]   ;;  %s2374_s2 = inlined_call_operand.hbm [shape: f32[32,64], index: 2, kind: input, shape index: {}]   ;;  %s2375_s3 = inlined_call_operand.hbm [shape: f32[64,1], index: 3, kind: input, shape index: {}]   ;;  %s2376_s4 = inlined_call_operand.hbm [shape: f32[64,1], index: 4, kind: input, shape index: {}]   ;;  %s2377_s5 = inlined_call_operand.hbm [shape: f32[2,64,1], index: 5, kind: output, shape index: {0}]   ;;  %s2378_s6 = inlined_call_operand.hbm [shape: f32[2,64,1], index: 6, kind: output, shape index: {1}]  }
   0x1   :  { %2386 = sst [smem:[#allocation23_spill]] %s2378_s6 }
   0x2   :  { %12 = vsyncpa [#allocation5], 0 }
   0x3   :  { %14 = vsyncpa [#allocation5 + $0x1], 0 }
   0x4   :  { %15 = vsyncpa [#allocation8], 0 }
   0x5   :  { %16 = vsyncpa [#allocation11], 0 }
   0x6   :  { %17 = vsyncpa [#allocation6], 0 }
   0x7   :  { %19 = vsyncpa [#allocation6 + $0x1], 0 }
   0x8   :  { %20 = vsyncpa [#allocation15], 0 }
   0x9   :  { %22 = vsyncpa [#allocation15 + $0x1], 0  ;;  %s1900_s21 = smov 0   ;;  %s1902_s22 = smov 0  }
   0xa   :  { %s1904_s23 = smov 0   ;;  %s1906_s24 = smov 0  }
   0xb   :  { %s1908_s25 = smov 0   ;;  %s1910_s26 = smov 0  }
   0xc LB: > { %2387 = sst [smem:[#allocation21_spill]] %s1829_s21  ;;  %s1228_s27 = sadd.s32 4294967295, %s1849_s26   ;;  %s1849_s26 = sphi %s1910_s26, %s28_s26   ;;  %s1845_s25 = sphi %s1908_s25, %s2411_s25   ;;  %s1841_s24 = sphi %s1906_s24, %s2410_s24   ;;  %s1837_s23 = sphi %s1904_s23, %s2409_s23   ;;  %s1833_s22 = sphi %s1902_s22, %s2408_s22   ;;  %s1829_s21 = sphi %s1900_s21, %s2407_s21  }
   0xd   : > { %s1229_s28 = sadd.s32 4294967294, %s1849_s26   ;;  %p62_p0 = scmp.ne.s32.totalorder %s1833_s22, %s1829_s21 }
   0xe   : > { %p1934_p1 = scmp.eq.s32.totalorder %s1228_s27, 0  ;;  %p1938_p2 = scmp.eq.s32.totalorder %s1228_s27, 1 }
   0xf   : > { %p176_p3 = scmp.eq.s32.totalorder %s1229_s28, 1  ;;  %p1230_p5 = scmp.ge.s32.totalorder %s1849_s26, 1 }
  0x10   : > { %s2388_s29 = scalar_select %p1934_p1, 1, 0 }
  0x11   : > { %s2389_s30 = scalar_select %p1938_p2, 1, 0 }
  0x12   : > { %p1944_p4 = por %p1934_p1, %p62_p0  ;;  %p1949_p6 = por %p176_p3, %p62_p0 }
  0x13   : > { %p209_p7 = scmp.lt.s32.totalorder %s1849_s26, 3  ;;  %s1851_s10 = smov [#allocation7]  }
  0x14   : > { %s2390_s7 = scalar_select %p1944_p4, 1, 0 }
  0x15   : > { %s2391_s8 = scalar_select %p1949_p6, 1, 0 }
  0x16   : > { %p1954_p8 = pnand %p1230_p5, %p209_p7  ;;  %s221_s11 = sshll.u32 %s1851_s10, 4  ;;  %s1958_s11 = int_to_ptr.vmem [resolvable:$true] %s221_s11 }
  0x17   : > { %2392 = sst [smem:[#allocation22_spill]] %s2391_s8  ;;  %s1852_s13 = smov [#allocation10]  }
  0x18   : > { %s2393_s9 = scalar_select %p1954_p8, 1, 0 }
  0x19   : > { %p1484_p9 = pneg %p1954_p8  ;;  %s247_s14 = sshll.u32 %s1852_s13, 4  ;;  %s1969_s14 = int_to_ptr.vmem [resolvable:$true] %s247_s14 }
  0x1a   : > { %s1853_s15 = smov [#allocation9]   ;;  %s1585_s19 = scalar_lea.hbm %s2373_s1, 1024 }
  0x1b   : > { %p1965_p11 = pnand %p1484_p9, %p1934_p1  ;;  %s1971_s16 = sshll.u32 %s1853_s15, 4  ;;  %s235_s16 = int_to_ptr.vmem [resolvable:$true] %s1971_s16 }
  0x1c   : > { %p1586_p12 = scmp.ne.s32.totalorder %s2373_s1, %s1585_s19  ;;  %p1592_p5 = scmp.lt.u32.totalorder %s1585_s19, %s2373_s1 }
  0x1d   : > { %p1981_p13 = pneg %p1965_p11 }
  0x1f   : > { %p1588_p0 = pnand %p1981_p13, %p1586_p12 }
  0x21   : > { %p1589_p3 = pneg %p1588_p0 }
  0x23   : > { %p1594_p7 = pnand %p1592_p5, %p1589_p3 }
  0x25   : > { %1597 = shalt.err (!%p1594_p7)
}
  0x26   : > { %s1598_s15 = scalar_lea.vmem %s1958_s11, 1024  ;;  %p1606_p1 = scmp.lt.s32.totalorder %s1958_s11, %s1958_s11 }
  0x27   : > { %p1599_p9 = scmp.ne.s32.totalorder %s1958_s11, %s1598_s15  ;;  %p1607_p4 = scmp.lt.s32.totalorder %s1598_s15, %s1598_s15 }
  0x29   : > { %p1601_p10 = pnand %p1599_p9, %p1981_p13  ;;  %p1608_p12 = por %p1607_p4, %p1606_p1 }
  0x2b   : > { %p1602_p6 = pneg %p1601_p10 }
  0x2d   : > { %p1609_p0 = pnand %p1608_p12, %p1602_p6 }
  0x2f   : > { %1612 = shalt.err (!%p1609_p0)
}
  0x30   : > { %s1854_s17 = smov 128   ;;  %s1855_s18 = smov 8  }
  0x31   : > { %1487 = dma.hbm_to_vmem [thread:$0]  (!%p1965_p11), %s2373_s1, 1024, %s1958_s11, [#allocation8], %s1854_s17, %s1854_s17, %s1855_s18  }
  0x32   : > { %s1613_s13 = scalar_lea.hbm %s2375_s3, 1024 }
  0x33   : > { %p1614_p1 = scmp.ne.s32.totalorder %s2375_s3, %s1613_s13  ;;  %p1620_p10 = scmp.lt.u32.totalorder %s1613_s13, %s2375_s3 }
  0x35   : > { %p1616_p4 = pnand %p1614_p1, %p1981_p13 }
  0x37   : > { %p1617_p6 = pneg %p1616_p4 }
  0x39   : > { %p1622_p3 = pnand %p1620_p10, %p1617_p6 }
  0x3b   : > { %1625 = shalt.err (!%p1622_p3)
}
  0x3c   : > { %s1626_s11 = scalar_lea.vmem %s1969_s14, 1024  ;;  %p1634_p12 = scmp.lt.s32.totalorder %s1969_s14, %s1969_s14 }
  0x3d   : > { %p1627_p5 = scmp.ne.s32.totalorder %s1969_s14, %s1626_s11  ;;  %p1635_p0 = scmp.lt.s32.totalorder %s1626_s11, %s1626_s11 }
  0x3f   : > { %p1629_p7 = pnand %p1627_p5, %p1981_p13  ;;  %p1636_p1 = por %p1635_p0, %p1634_p12 }
  0x41   : > { %p1630_p9 = pneg %p1629_p7 }
  0x43   : > { %p1637_p4 = pnand %p1636_p1, %p1630_p9 }
  0x45   : > { %1640 = shalt.err (!%p1637_p4)
}
  0x46   : > { %1493 = dma.hbm_to_vmem [thread:$0]  (!%p1965_p11), %s2375_s3, 1024, %s1969_s14, [#allocation11], %s1854_s17, %s1854_s17, %s1855_s18  }
  0x47   : > { %s1641_s20 = scalar_lea.hbm %s2374_s2, 512 }
  0x48   : > { %p1642_p6 = scmp.ne.s32.totalorder %s2374_s2, %s1641_s20  ;;  %p1648_p5 = scmp.lt.u32.totalorder %s1641_s20, %s2374_s2 }
  0x4a   : > { %p1644_p10 = pnand %p1642_p6, %p1981_p13 }
  0x4c   : > { %p1645_p3 = pneg %p1644_p10 }
  0x4e   : > { %p1650_p7 = pnand %p1648_p5, %p1645_p3 }
  0x50   : > { %1653 = shalt.err (!%p1650_p7)
}
  0x51   : > { %s1654_s11 = scalar_lea.vmem %s235_s16, 512  ;;  %p1662_p1 = scmp.lt.s32.totalorder %s235_s16, %s235_s16 }
  0x52   : > { %p1655_p9 = scmp.ne.s32.totalorder %s235_s16, %s1654_s11  ;;  %p1663_p4 = scmp.lt.s32.totalorder %s1654_s11, %s1654_s11 }
  0x54   : > { %p1657_p12 = pnand %p1655_p9, %p1981_p13  ;;  %p1664_p8 = por %p1663_p4, %p1662_p1 }
  0x56   : > { %p1658_p0 = pneg %p1657_p12 }
  0x58   : > { %p1665_p2 = pnand %p1664_p8, %p1658_p0 }
  0x5a   : > { %1668 = shalt.err (!%p1665_p2)
}
  0x5b   : > { %1490 = dma.hbm_to_vmem [thread:$0]  (!%p1965_p11), %s2374_s2, 512, %s235_s16, [#allocation8], %s1854_s17, %s1854_s17, %s1855_s18  }
  0x5c   : > { %s1856_s21 = smov [#allocation12]   ;;  %s1669_s27 = scalar_lea.hbm %s2376_s4, 1024 }
  0x5d   : > { %s260_s8 = sshll.u32 %s1856_s21, 4  ;;  %p1670_p2 = scmp.ne.s32.totalorder %s2376_s4, %s1669_s27  ;;  %s261_s8 = int_to_ptr.vmem [resolvable:$true] %s260_s8 }
  0x5e   : > { %p1676_p10 = scmp.lt.u32.totalorder %s1669_s27, %s2376_s4 }
  0x5f   : > { %p1672_p8 = pnand %p1670_p2, %p1981_p13 }
  0x61   : > { %p1673_p6 = pneg %p1672_p8 }
  0x63   : > { %p1678_p3 = pnand %p1676_p10, %p1673_p6 }
  0x65   : > { %1681 = shalt.err (!%p1678_p3)
}
  0x66   : > { %s1682_s16 = scalar_lea.vmem %s261_s8, 1024  ;;  %p1690_p12 = scmp.lt.s32.totalorder %s261_s8, %s261_s8 }
  0x67   : > { %p1683_p5 = scmp.ne.s32.totalorder %s261_s8, %s1682_s16  ;;  %p1691_p0 = scmp.lt.s32.totalorder %s1682_s16, %s1682_s16 }
  0x69   : > { %p1685_p7 = pnand %p1683_p5, %p1981_p13  ;;  %p1692_p1 = por %p1691_p0, %p1690_p12 }
  0x6b   : > { %p1686_p9 = pneg %p1685_p7 }
  0x6d   : > { %p1693_p4 = pnand %p1692_p1, %p1686_p9 }
  0x6f   : > { %1696 = shalt.err (!%p1693_p4)
}
  0x70   : > { %1496 = dma.hbm_to_vmem [thread:$0]  (!%p1965_p11), %s2376_s4, 1024, %s261_s8, [#allocation11], %s1854_s17, %s1854_s17, %s1855_s18  }
  0x71   : > { %s40_s28 = sadd.s32 1, %s1845_s25  ;;  %s49_s12 = sadd.s32 1, %s1837_s23 }
  0x72   : > { %p42_p13 = scmp.ge.s32.totalorder %s40_s28, 2  ;;  %p56_p2 = scmp.ne.s32.totalorder %s1837_s23, %s1833_s22 }
  0x73   : > { %p57_p8 = scmp.eq.s32.totalorder %s1849_s26, 0  ;;  %p1512_p6 = scmp.lt.s32.totalorder %s1849_s26, 2 }
  0x74   : > { %s2413_s28 = smov (%p42_p13, %s40_s28), 0  ;;  %p2396_p3 = scmp.ne.s32.totalorder %s2389_s30, 0 }
  0x75   : > { %p58_p10 = por %p57_p8, %p56_p2  ;;  %s44_s19 = ssub.s32 %s1845_s25, %s2413_s28 }
  0x76   : > { %p2084_p5 = por %p2396_p3, %p56_p2  ;;  %s274_s20 = sand.u32 1, %s1837_s23  }
  0x77   : > { %p47_p7 = scmp.eq.s32.totalorder %s44_s19, 0  ;;  %s1236_s17 = sshll.u32 %s274_s20, 7 }
  0x78   : > { %s1279_s18 = sshll.u32 %s1845_s25, 11  ;;  %s278_s30 = scalar_lea.vmem [#allocation4], %s1236_s17 }
  0x79   : > { %s2093_s8 = scalar_select %p47_p7, %s1837_s23, %s49_s12  }
  0x7a   : > { %s2098_s13 = scalar_lea.hbm %s2372_s0, %s1279_s18  ;;  %s287_s15 = sshll.u32 %s278_s30, 4  ;;  %s2106_s15 = int_to_ptr.vmem [resolvable:$true] %s287_s15 }
  0x7b   : > { %p2102_p11 = pnand %p1512_p6, %p58_p10  ;;  %s2108_s16 = scalar_lea.sflag [#allocation5], %s274_s20 }
  0x7c   : > { %s1697_s14 = scalar_lea.hbm %s2098_s13, 2048  ;;  %s1702_s19 = scalar_lea.hbm %s2372_s0, 4096 }
  0x7d   : > { %p1698_p9 = scmp.ne.s32.totalorder %s2098_s13, %s1697_s14  ;;  %p1699_p12 = pneg %p2102_p11 }
  0x7e   : > { %p1703_p4 = scmp.lt.u32.totalorder %s2098_s13, %s2372_s0  ;;  %p1704_p13 = scmp.lt.u32.totalorder %s1702_s19, %s1697_s14 }
  0x7f   : > { %p1700_p0 = pnand %p1699_p12, %p1698_p9  ;;  %p1706_p8 = scmp.lt.u32.totalorder %s1697_s14, %s2098_s13 }
  0x80   : > { %p1705_p2 = por %p1704_p13, %p1703_p4 }
  0x81   : > { %p1701_p1 = pneg %p1700_p0 }
  0x82   : > { %p1707_p6 = por %p1706_p8, %p1705_p2 }
  0x84   : > { %p1708_p10 = pnand %p1707_p6, %p1701_p1 }
  0x86   : > { %1711 = shalt.err (!%p1708_p10)
}
  0x87   : > { %s1712_s20 = scalar_lea.vmem %s2106_s15, 2048  ;;  %s1857_s27 = smov [#allocation4]  }
  0x88   : > { %p1713_p3 = scmp.ne.s32.totalorder %s2106_s15, %s1712_s20  ;;  %s1717_s10 = sshll.u32 %s1857_s27, 4  ;;  %s1718_s10 = int_to_ptr.vmem [resolvable:$false] %s1717_s10 }
  0x89   : > { %s1719_s30 = scalar_lea.vmem %s1718_s10, 4096  ;;  %p1720_p0 = scmp.lt.s32.totalorder %s2106_s15, %s1718_s10 }
  0x8a   : > { %p1715_p7 = pnand %p1713_p3, %p1699_p12  ;;  %p1721_p4 = scmp.lt.s32.totalorder %s1719_s30, %s1712_s20 }
  0x8c   : > { %p1716_p9 = pneg %p1715_p7  ;;  %p1722_p13 = por %p1721_p4, %p1720_p0 }
  0x8e   : > { %p1723_p2 = pnand %p1722_p13, %p1716_p9 }
  0x90   : > { %1726 = shalt.err (!%p1723_p2)
}
  0x91   : > { %s1858_s14 = smov 256   ;;  %s1859_s6 = smov 16  }
  0x92   : > { %1500 = dma.hbm_to_vmem [thread:$0]  (!%p2102_p11), %s2098_s13, 2048, %s2106_s15, %s2108_s16, %s1858_s14, %s1858_s14, %s1859_s6  }
  0x93   : > { %p2399_p12 = scmp.ne.s32.totalorder %s2393_s9, 0 }
  0x94   : > { %s2139_s12 = sand.u32 (!%p2399_p12), 1, %s1833_s22   ;;  %p2400_p1 = scmp.ne.s32.totalorder (!%p2399_p12), %s2390_s7, 0 }
  0x95   : > { %299 = sbr.rel (%p2399_p12) target bundleno = 864 (0x360), region = 40  ;;  %s1240_s19 = sshll.u32 (!%p2399_p12), %s2139_s12, 7 }
  0x96   : > { %s302_s17 = scalar_lea.sflag (!%p2399_p12), [#allocation5], %s2139_s12  ;;  %s2143_s18 = scalar_lea.vmem (!%p2399_p12), [#allocation4], %s1240_s19 }
  0x9c   : > { %1808 = dma.done.wait (%p2400_p1), %s302_s17, 2048  }
  0x9d   : > { %1810 = vsyncadd (%p2400_p1), %s302_s17, 4294965248  ;;  %p2401_p11 = scmp.ne.s32.totalorder %s2388_s29, 0 }
  0x9f   : > { %1812 = dma.done.wait (%p2401_p11), [#allocation8], 1536  }
  0xa0   : > { %1814 = vsyncadd (%p2401_p11), [#allocation8], 4294965760 }
  0xa1   : > { %1816 = dma.done.wait (%p2401_p11), [#allocation11], 2048  }
  0xa2   : > { %1818 = vsyncadd (%p2401_p11), [#allocation11], 4294965248  ;;  %vm360_vm0 = vcmask 7168   ;;  %v1860_v0 = vmov 0.0   ;;  %v383_v1 = vld [vmem:[%s2143_s18 + $0x30] sm:$0xff]  ;;  %v384_v2 = vld [vmem:[%s2143_s18 + $0x38] sm:$0xff] }
  0xa3   : > { %364 = vst.msk [vmem:[#allocation2 + $0x18] sm:$0xff] %vm360_vm0, %v1860_v0  ;;  %361 = vst.msk [vmem:[#allocation2] sm:$0xff] %vm360_vm0, %v1860_v0  ;;  %v377_v3 = vld [vmem:[%s2143_s18] sm:$0xff]  ;;  %v410_v4 = vadd.f32 %v384_v2, %v383_v1  ;;  %v378_v5 = vld [vmem:[%s2143_s18 + $0x8] sm:$0xff]  ;;  %v456_v17 = vmul.f32 %v383_v1, %v383_v1  ;;  %v457_v18 = vmul.f32 %v384_v2, %v384_v2  ;;  %vm521_vm1 = vcmask 523264   ;;  %s1245_s29 = sshll.u32 %s2139_s12, 6 }
  0xa4   : > { %362 = vst.msk [vmem:[#allocation2 + $0x8] sm:$0xff] %vm360_vm0, %v1860_v0  ;;  %363 = vst.msk [vmem:[#allocation2 + $0x10] sm:$0xff] %vm360_vm0, %v1860_v0  ;;  %v450_v6 = vmul.f32 %v377_v3, %v377_v3  ;;  %v379_v7 = vld [vmem:[%s2143_s18 + $0x10] sm:$0xff]  ;;  %v380_v8 = vld [vmem:[%s2143_s18 + $0x18] sm:$0xff]  ;;  %v401_v9 = vadd.f32 %v378_v5, %v377_v3  ;;  %v451_v10 = vmul.f32 %v378_v5, %v378_v5  ;;  %vm748_vm2 = vcmask 261120   ;;  %s2234_s7 = scalar_lea.vmem [#allocation13], %s1245_s29 }
  0xa5   : > { %365 = vst.msk [vmem:[#allocation2 + $0x20] sm:$0xff] %vm360_vm0, %v1860_v0  ;;  %366 = vst.msk [vmem:[#allocation2 + $0x28] sm:$0xff] %vm360_vm0, %v1860_v0  ;;  %411 = vadd.xlane.f32.xlu1 %v410_v4  ;;  %v452_v11 = vmul.f32 %v379_v7, %v379_v7  ;;  %v453_v12 = vmul.f32 %v380_v8, %v380_v8  ;;  %v404_v14 = vadd.f32 %v380_v8, %v379_v7  ;;  %v381_v15 = vld [vmem:[%s2143_s18 + $0x20] sm:$0xff]  ;;  %v382_v16 = vld [vmem:[%s2143_s18 + $0x28] sm:$0xff]  ;;  %s2240_s9 = scalar_lea.vmem [#allocation14], %s1245_s29  ;;  %s1280_s13 = sshll.u32 %s1841_s24, 10 }
  0xa6   : > { %367 = vst.msk [vmem:[#allocation2 + $0x30] sm:$0xff] %vm360_vm0, %v1860_v0  ;;  %368 = vst.msk [vmem:[#allocation2 + $0x38] sm:$0xff] %vm360_vm0, %v1860_v0  ;;  %402 = vadd.xlane.f32.xlu0 %v401_v9  ;;  %v466_v13 = vadd.f32 %v451_v10, %v450_v6  ;;  %v407_v20 = vadd.f32 %v382_v16, %v381_v15  ;;  %v454_v21 = vmul.f32 %v381_v15, %v381_v15  ;;  %v387_v25 = vld [vmem:[%s2143_s18 + $0x50] sm:$0xff]  ;;  %v388_v26 = vld [vmem:[%s2143_s18 + $0x58] sm:$0xff]  ;;  %s1058_s15 = sshll.u32 %s2234_s7, 4  ;;  %s2265_s20 = scalar_lea.hbm %s2377_s5, %s1280_s13  ;;  %s2267_s15 = int_to_ptr.vmem [resolvable:$true] %s1058_s15 }
  0xa7   : > { %369 = vst.msk [vmem:[#allocation3] sm:$0xff] %vm360_vm0, %v1860_v0  ;;  %370 = vst.msk [vmem:[#allocation3 + $0x8] sm:$0xff] %vm360_vm0, %v1860_v0  ;;  %v469_v19 = vadd.f32 %v453_v12, %v452_v11  ;;  %v455_v22 = vmul.f32 %v382_v16, %v382_v16  ;;  %v475_v23 = vadd.f32 %v457_v18, %v456_v17  ;;  %v385_v27 = vld [vmem:[%s2143_s18 + $0x40] sm:$0xff]  ;;  %v386_v28 = vld [vmem:[%s2143_s18 + $0x48] sm:$0xff]  ;;  %s1074_s27 = sshll.u32 %s2240_s9, 4  ;;  %s1040_s10 = scalar_lea.sflag [#allocation6], %s2139_s12  ;;  %s2316_s27 = int_to_ptr.vmem [resolvable:$true] %s1074_s27 }
  0xa8   : > { %371 = vst.msk [vmem:[#allocation3 + $0x10] sm:$0xff] %vm360_vm0, %v1860_v0  ;;  %372 = vst.msk [vmem:[#allocation3 + $0x18] sm:$0xff] %vm360_vm0, %v1860_v0  ;;  %v416_v29 = vadd.f32 %v388_v26, %v387_v25  ;;  %v460_v30 = vmul.f32 %v387_v25, %v387_v25  ;;  %v461_v31 = vmul.f32 %v388_v26, %v388_v26  ;;  %v391_v37 = vld [vmem:[%s2143_s18 + $0x70] sm:$0xff]  ;;  %v392_v38 = vld [vmem:[%s2143_s18 + $0x78] sm:$0xff]  ;;  %s1727_s30 = scalar_lea.vmem %s2267_s15, 1024  ;;  %s1861_s14 = smov [#allocation13]  }
  0xa9   : > { %373 = vst.msk [vmem:[#allocation3 + $0x20] sm:$0xff] %vm360_vm0, %v1860_v0  ;;  %374 = vst.msk [vmem:[#allocation3 + $0x28] sm:$0xff] %vm360_vm0, %v1860_v0  ;;  %467 = vadd.xlane.f32.xlu1 %v466_v13  ;;  %v472_v24 = vadd.f32 %v455_v22, %v454_v21  ;;  %v413_v32 = vadd.f32 %v386_v28, %v385_v27  ;;  %v458_v33 = vmul.f32 %v385_v27, %v385_v27  ;;  %v389_v39 = vld [vmem:[%s2143_s18 + $0x60] sm:$0xff]  ;;  %v390_v40 = vld [vmem:[%s2143_s18 + $0x68] sm:$0xff]  ;;  %p1728_p8 = scmp.ne.s32.totalorder %s2267_s15, %s1727_s30  ;;  %s1731_s6 = sshll.u32 %s1861_s14, 4  ;;  %s1732_s6 = int_to_ptr.vmem [resolvable:$false] %s1731_s6 }
  0xaa   : > { %375 = vst.msk [vmem:[#allocation3 + $0x30] sm:$0xff] %vm360_vm0, %v1860_v0  ;;  %376 = vst.msk [vmem:[#allocation3 + $0x38] sm:$0xff] %vm360_vm0, %v1860_v0  ;;  %405 = vadd.xlane.f32.xlu0 %v404_v14  ;;  %v459_v34 = vmul.f32 %v386_v28, %v386_v28  ;;  %v481_v35 = vadd.f32 %v461_v31, %v460_v30  ;;  %v422_v41 = vadd.f32 %v392_v38, %v391_v37  ;;  %v509_v49 = vld [vmem:[#allocation9] sm:$0xff]  ;;  %v396_v50 = vld [vmem:[#allocation2 + $0x18] sm:$0xff]  ;;  %s1733_s19 = scalar_lea.vmem %s1732_s6, 2048  ;;  %p1734_p3 = scmp.lt.s32.totalorder %s2267_s15, %s1732_s6 }
  0xab   : > { %v464_v42 = vmul.f32 %v391_v37, %v391_v37  ;;  %v465_v43 = vmul.f32 %v392_v38, %v392_v38  ;;  %v419_v44 = vadd.f32 %v390_v40, %v389_v39  ;;  %v462_v45 = vmul.f32 %v389_v39, %v389_v39  ;;  %1346 = vmatprep.mubr.msk.f32.mxu0 %vm521_vm1, %v509_v49  ;;  %v393_v51 = vld [vmem:[#allocation2] sm:$0xff]  ;;  %v394_v57 = vld [vmem:[#allocation2 + $0x8] sm:$0xff]  ;;  %v395_v63 = vld [vmem:[#allocation2 + $0x10] sm:$0xff]  ;;  %p1729_p6 = pnand %p1728_p8, %p2084_p5  ;;  %p1735_p7 = scmp.lt.s32.totalorder %s1733_s19, %s1727_s30 }
  0xac   : > { %v478_v36 = vadd.f32 %v459_v34, %v458_v33  ;;  %v463_v46 = vmul.f32 %v390_v40, %v390_v40  ;;  %1368 = vmatprep.mubr.msk.f32.mxu1 %vm521_vm1, %v509_v49  ;;  %v398_v10 = vld [vmem:[#allocation2 + $0x28] sm:$0xff]  ;;  %v397_v11 = vld [vmem:[#allocation2 + $0x20] sm:$0xff] }
  0xad   : > { %470 = vadd.xlane.f32.xlu1 %v469_v19  ;;  %v487_v47 = vadd.f32 %v465_v43, %v464_v42  ;;  %v400_v31 = vld [vmem:[#allocation2 + $0x38] sm:$0xff]  ;;  %v399_v33 = vld [vmem:[#allocation2 + $0x30] sm:$0xff]  ;;  %p1730_p10 = pneg %p1729_p6  ;;  %p1736_p9 = por %p1735_p7, %p1734_p3 }
  0xae   : > { %408 = vadd.xlane.f32.xlu0 %v407_v20  ;;  %v484_v48 = vadd.f32 %v463_v46, %v462_v45  ;;  %v442_v56 = vld [vmem:[#allocation3] sm:$0xff]  ;;  %v443_v62 = vld [vmem:[#allocation3 + $0x8] sm:$0xff] }
  0xaf   : > { %v445_v4 = vld [vmem:[#allocation3 + $0x18] sm:$0xff]  ;;  %v444_v5 = vld [vmem:[#allocation3 + $0x10] sm:$0xff]  ;;  %p1737_p0 = pnand %p1736_p9, %p1730_p10 }
  0xb0   : > { %v447_v19 = vld [vmem:[#allocation3 + $0x28] sm:$0xff]  ;;  %v446_v22 = vld [vmem:[#allocation3 + $0x20] sm:$0xff] }
  0xb1   : > { %476 = vadd.xlane.f32.xlu1 %v475_v23  ;;  %v449_v40 = vld [vmem:[#allocation3 + $0x38] sm:$0xff]  ;;  %v448_v42 = vld [vmem:[#allocation3 + $0x30] sm:$0xff] }
  0xb2   : > { %473 = vadd.xlane.f32.xlu0 %v472_v24 }
  0xb5   : > { %417 = vadd.xlane.f32.xlu1 %v416_v29 }
  0xb6   : > { %414 = vadd.xlane.f32.xlu0 %v413_v32 }
  0xb9   : > { %482 = vadd.xlane.f32.xlu1 %v481_v35 }
  0xba   : > { %479 = vadd.xlane.f32.xlu0 %v478_v36 }
  0xbd   : > { %423 = vadd.xlane.f32.xlu1 %v422_v41 }
  0xbe   : > { %420 = vadd.xlane.f32.xlu0 %v419_v44 }
  0xc1   : > { %488 = vadd.xlane.f32.xlu1 %v487_v47 }
  0xc2   : > { %485 = vadd.xlane.f32.xlu0 %v484_v48 }
 0x132   : > { %v412_v52 = vpop.xlane.xlu1 %411 }
 0x133   : > { %v428_v53 = vadd.f32 %v412_v52, %v396_v50  ;;  %v403_v54 = vpop.xlane.xlu0 %402 }
 0x134   : > { %v425_v55 = vadd.f32 %v403_v54, %v393_v51 }
 0x135   : > { %437 = vst.msk [vmem:[#allocation2 + $0x18] sm:$0xff] %vm360_vm0, %v428_v53 }
 0x136   : > { %434 = vst.msk [vmem:[#allocation2] sm:$0xff] %vm360_vm0, %v425_v55  ;;  %v468_v58 = vpop.xlane.xlu1 %467 }
 0x137   : > { %v490_v59 = vadd.f32 %v468_v58, %v442_v56  ;;  %v406_v60 = vpop.xlane.xlu0 %405  ;;  %v510_v56 = vld [vmem:[#allocation9 + $0x8] sm:$0xff] }
 0x138   : > { %v426_v61 = vadd.f32 %v406_v60, %v394_v57  ;;  %v512_v60 = vld [vmem:[#allocation9 + $0x18] sm:$0xff] }
 0x139   : > { %498 = vst.msk [vmem:[#allocation3] sm:$0xff] %vm360_vm0, %v490_v59  ;;  %v511_v59 = vld [vmem:[#allocation9 + $0x10] sm:$0xff] }
 0x13a   : > { %435 = vst.msk [vmem:[#allocation2 + $0x8] sm:$0xff] %vm360_vm0, %v426_v61  ;;  %v471_v0 = vpop.xlane.xlu1 %470  ;;  %v740_v61 = vld [vmem:[#allocation7] sm:$0xff] }
 0x13b   : > { %v491_v1 = vadd.f32 %v471_v0, %v443_v62  ;;  %v409_v2 = vpop.xlane.xlu0 %408 }
 0x13c   : > { %v427_v3 = vadd.f32 %v409_v2, %v395_v63  ;;  %v516_v24 = vld [vmem:[#allocation2 + $0x18] sm:$0xff] }
 0x13d   : > { %499 = vst.msk [vmem:[#allocation3 + $0x8] sm:$0xff] %vm360_vm0, %v491_v1  ;;  %v513_v12 = vld [vmem:[#allocation2] sm:$0xff] }
 0x13e   : > { %436 = vst.msk [vmem:[#allocation2 + $0x10] sm:$0xff] %vm360_vm0, %v427_v3  ;;  %v477_v6 = vpop.xlane.xlu1 %476 }
 0x13f   : > { %v493_v7 = vadd.f32 %v477_v6, %v445_v4  ;;  %v474_v8 = vpop.xlane.xlu0 %473 }
 0x140   : > { %v492_v9 = vadd.f32 %v474_v8, %v444_v5  ;;  %v623_v20 = vld [vmem:[#allocation3] sm:$0xff] }
 0x141   : > { %501 = vst.msk [vmem:[#allocation3 + $0x18] sm:$0xff] %vm360_vm0, %v493_v7  ;;  %v514_v13 = vld [vmem:[#allocation2 + $0x8] sm:$0xff] }
 0x142   : > { %500 = vst.msk [vmem:[#allocation3 + $0x10] sm:$0xff] %vm360_vm0, %v492_v9  ;;  %v418_v14 = vpop.xlane.xlu1 %417  ;;  %v1414_v15 = vpack.c.bf16 %v514_v13, %v513_v12 }
 0x143   : > { %v430_v16 = vadd.f32 %v418_v14, %v398_v10  ;;  %v415_v17 = vpop.xlane.xlu0 %414 }
 0x144   : > { %v429_v18 = vadd.f32 %v415_v17, %v397_v11  ;;  %1415 = vmatprep.subr.bf16.mxu0 %v1414_v15  ;;  %v624_v21 = vld [vmem:[#allocation3 + $0x8] sm:$0xff] }
 0x145   : > { %439 = vst.msk [vmem:[#allocation2 + $0x28] sm:$0xff] %vm360_vm0, %v430_v16  ;;  %1417 = vmatpush3.bf16.msra.mxu0 %v1414_v15  ;;  %v515_v23 = vld [vmem:[#allocation2 + $0x10] sm:$0xff]  ;;  %v1430_v25 = vpack.c.bf16 %v624_v21, %v623_v20 }
 0x146   : > { %438 = vst.msk [vmem:[#allocation2 + $0x20] sm:$0xff] %vm360_vm0, %v429_v18  ;;  %v483_v26 = vpop.xlane.xlu1 %482  ;;  %v1418_v27 = vpack.c.bf16 %v516_v24, %v515_v23 }
 0x147   : > { %v495_v28 = vadd.f32 %v483_v26, %v447_v19  ;;  %v480_v29 = vpop.xlane.xlu0 %479  ;;  %1431 = vmatprep.subr.bf16.mxu1 %v1430_v25  ;;  %v741_v26 = vld [vmem:[#allocation7 + $0x8] sm:$0xff] }
 0x148   : > { %v494_v30 = vadd.f32 %v480_v29, %v446_v22  ;;  %1419 = vmatprep.subr.bf16.mxu0 %v1418_v27  ;;  %1433 = vmatpush3.bf16.msra.mxu1 %v1430_v25  ;;  %v626_v32 = vld [vmem:[#allocation3 + $0x18] sm:$0xff]  ;;  %v742_v29 = vld [vmem:[#allocation7 + $0x10] sm:$0xff] }
 0x149   : > { %503 = vst.msk [vmem:[#allocation3 + $0x28] sm:$0xff] %vm360_vm0, %v495_v28  ;;  %1421 = vmatpush3.bf16.msra.mxu0 %v1418_v27  ;;  %v625_v34 = vld [vmem:[#allocation3 + $0x10] sm:$0xff] }
 0x14a   : > { %502 = vst.msk [vmem:[#allocation3 + $0x20] sm:$0xff] %vm360_vm0, %v494_v30  ;;  %v424_v35 = vpop.xlane.xlu1 %423  ;;  %v1434_v36 = vpack.c.bf16 %v626_v32, %v625_v34 }
 0x14b   : > { %v432_v37 = vadd.f32 %v424_v35, %v400_v31  ;;  %v421_v38 = vpop.xlane.xlu0 %420  ;;  %v744_v35 = vld [vmem:[#allocation7 + $0x20] sm:$0xff] }
 0x14c   : > { %v431_v39 = vadd.f32 %v421_v38, %v399_v33  ;;  %1435 = vmatprep.subr.bf16.mxu1 %v1434_v36  ;;  %v518_v41 = vld [vmem:[#allocation2 + $0x28] sm:$0xff]  ;;  %v743_v33 = vld [vmem:[#allocation7 + $0x18] sm:$0xff] }
 0x14d   : > { %441 = vst.msk [vmem:[#allocation2 + $0x38] sm:$0xff] %vm360_vm0, %v432_v37  ;;  %1437 = vmatpush3.bf16.msra.mxu1 %v1434_v36  ;;  %v517_v43 = vld [vmem:[#allocation2 + $0x20] sm:$0xff]  ;;  %v745_v36 = vld [vmem:[#allocation7 + $0x28] sm:$0xff]  ;;  %v746_v37 = vld [vmem:[#allocation7 + $0x30] sm:$0xff] }
 0x14e   : > { %440 = vst.msk [vmem:[#allocation2 + $0x30] sm:$0xff] %vm360_vm0, %v431_v39  ;;  %v489_v44 = vpop.xlane.xlu1 %488  ;;  %v1422_v45 = vpack.c.bf16 %v518_v41, %v517_v43  ;;  %v747_v39 = vld [vmem:[#allocation7 + $0x38] sm:$0xff] }
 0x14f   : > { %v497_v46 = vadd.f32 %v489_v44, %v449_v40  ;;  %v486_v47 = vpop.xlane.xlu0 %485 }
 0x150   : > { %v496_v48 = vadd.f32 %v486_v47, %v448_v42  ;;  %1423 = vmatprep.subr.bf16.mxu0 %v1422_v45  ;;  %v628_v49 = vld [vmem:[#allocation3 + $0x28] sm:$0xff] }
 0x151   : > { %505 = vst.msk [vmem:[#allocation3 + $0x38] sm:$0xff] %vm360_vm0, %v497_v46  ;;  %1425 = vmatpush3.bf16.msra.mxu0 %v1422_v45  ;;  %v627_v50 = vld [vmem:[#allocation3 + $0x20] sm:$0xff] }
 0x152   : > { %504 = vst.msk [vmem:[#allocation3 + $0x30] sm:$0xff] %vm360_vm0, %v496_v48  ;;  %v1438_v51 = vpack.c.bf16 %v628_v49, %v627_v50 }
 0x154   : > { %1439 = vmatprep.subr.bf16.mxu1 %v1438_v51  ;;  %v520_v52 = vld [vmem:[#allocation2 + $0x38] sm:$0xff] }
 0x155   : > { %1441 = vmatpush3.bf16.msra.mxu1 %v1438_v51  ;;  %v519_v53 = vld [vmem:[#allocation2 + $0x30] sm:$0xff] }
 0x156   : > { %v1426_v54 = vpack.c.bf16 %v520_v52, %v519_v53  ;;  %v984_v53 = vld [vmem:[#allocation10 + $0x8] sm:$0xff] }
 0x158   : > { %1427 = vmatprep.subr.bf16.mxu0 %v1426_v54  ;;  %v630_v55 = vld [vmem:[#allocation3 + $0x38] sm:$0xff] }
 0x159   : > { %1429 = vmatpush3.bf16.msra.mxu0 %v1426_v54  ;;  %v629_v57 = vld [vmem:[#allocation3 + $0x30] sm:$0xff]  ;;  %v983_v54 = vld [vmem:[#allocation10] sm:$0xff] }
 0x15a   : > { %v1442_v58 = vpack.c.bf16 %v630_v55, %v629_v57 }
 0x15c   : > { %1347 = vmatmul.mubr.msk.f32.vlgmr.msra.gmra.mrb[0].mxu0 %vm521_vm1, %v510_v56  ;;  %1443 = vmatprep.subr.bf16.mxu1 %v1442_v58 }
 0x15d   : > { %1445 = vmatpush3.bf16.msra.mxu1 %v1442_v58  ;;  %1349 = vmatprep.mubr.msk.f32.mxu0 %vm521_vm1, %v511_v59 }
 0x160   : > { %1350 = vmatmul.mubr.msk.f32.gmra.mrb[2].mxu0 %vm521_vm1, %v512_v60  ;;  %1369 = vmatmul.mubr.msk.f32.vlgmr.msra.gmra.mrb[0].mxu1 %vm521_vm1, %v510_v56 }
 0x161   : > { %1371 = vmatprep.mubr.msk.f32.mxu1 %vm521_vm1, %v511_v59  ;;  %1382 = vmatprep.mubr.msk.f32.mxu0 %vm748_vm2, %v740_v61  ;;  %v1000_v59 = vld [vmem:[#allocation12 + $0x8] sm:$0xff] }
 0x164   : > { %1372 = vmatmul.mubr.msk.f32.gmra.mrb[2].mxu1 %vm521_vm1, %v512_v60  ;;  %v986_v60 = vld [vmem:[#allocation10 + $0x18] sm:$0xff] }
 0x165   : > { %1402 = vmatprep.mubr.msk.f32.mxu1 %vm748_vm2, %v740_v61 }
 0x22f   : > { %v1348_v62 = vpop.f32.mrb[0].mxu0 }
 0x230   : > { %v620_v63 = vmul.f32 0.001953125, %v1348_v62  ;;  %v600_v0 = vpop.f32.mrb[1].mxu0  ;;  %v999_v62 = vld [vmem:[#allocation12] sm:$0xff] }
 0x231   : > { %v619_v1 = vmul.f32 0.001953125, %v600_v0 }
 0x232   : > { %v721_v2 = vmul.f32 %v620_v63, %v620_v63 }
 0x233   : > { %v720_v3 = vmul.f32 %v619_v1, %v619_v1  ;;  %v1446_v4 = vpack.c.bf16 %v620_v63, %v619_v1  ;;  %v1351_v5 = vpop.f32.mrb[2].mxu0  ;;  %v1370_v6 = vpop.f32.mrb[0].mxu1  ;;  %v985_v63 = vld [vmem:[#allocation10 + $0x10] sm:$0xff] }
 0x234   : > { %v622_v7 = vmul.f32 0.001953125, %v1351_v5  ;;  %v717_v8 = vmul.f32 0.001953125, %v1370_v6  ;;  %v610_v9 = vpop.f32.mrb[3].mxu0  ;;  %v697_v10 = vpop.f32.mrb[1].mxu1 }
 0x235   : > { %v621_v11 = vmul.f32 0.001953125, %v610_v9  ;;  %v716_v12 = vmul.f32 0.001953125, %v697_v10  ;;  %1447 = vmatprep.subr.bf16.mxu0 %v1446_v4  ;;  %v1001_v10 = vld [vmem:[#allocation12 + $0x10] sm:$0xff] }
 0x236   : > { %v723_v13 = vmul.f32 %v622_v7, %v622_v7  ;;  %v725_v14 = vsub.f32 %v717_v8, %v721_v2  ;;  %1449 = vmatpush3.bf16.msra.mxu0 %v1446_v4  ;;  %v988_v8 = vld [vmem:[#allocation10 + $0x28] sm:$0xff] }
 0x237   : > { %v722_v15 = vmul.f32 %v621_v11, %v621_v11  ;;  %v1450_v16 = vpack.c.bf16 %v622_v7, %v621_v11  ;;  %v724_v17 = vsub.f32 %v716_v12, %v720_v3  ;;  %v1373_v18 = vpop.f32.mrb[2].mxu1  ;;  %v1002_v7 = vld [vmem:[#allocation12 + $0x18] sm:$0xff]  ;;  %v987_v11 = vld [vmem:[#allocation10 + $0x20] sm:$0xff] }
 0x238   : > { %v729_v19 = vmax.f32 %v725_v14, 0.0  ;;  %v719_v20 = vmul.f32 0.001953125, %v1373_v18  ;;  %v707_v21 = vpop.f32.mrb[3].mxu1 }
 0x239   : > { %v728_v22 = vmax.f32 %v724_v17, 0.0  ;;  %v718_v23 = vmul.f32 0.001953125, %v707_v21  ;;  %1451 = vmatprep.subr.bf16.mxu0 %v1450_v16 }
 0x23a   : > { %v733_v24 = vadd.f32 1e-06, %v729_v19  ;;  %v727_v25 = vsub.f32 %v719_v20, %v723_v13  ;;  %1453 = vmatpush3.bf16.msra.mxu0 %v1450_v16  ;;  %v1004_v19 = vld [vmem:[#allocation12 + $0x28] sm:$0xff]  ;;  %v990_v20 = vld [vmem:[#allocation10 + $0x38] sm:$0xff] }
 0x23b   : > { %v732_v27 = vadd.f32 1e-06, %v728_v22  ;;  %v726_v28 = vsub.f32 %v718_v23, %v722_v15  ;;  %v1003_v22 = vld [vmem:[#allocation12 + $0x20] sm:$0xff]  ;;  %v989_v23 = vld [vmem:[#allocation10 + $0x30] sm:$0xff] }
 0x23c   : > { %1577 = vrsqrt.f32 %v733_v24  ;;  %v731_v30 = vmax.f32 %v727_v25, 0.0 }
 0x23d   : > { %1579 = vrsqrt.f32 %v732_v27  ;;  %v730_v31 = vmax.f32 %v726_v28, 0.0  ;;  %1383 = vmatmul.mubr.msk.f32.vlgmr.msra.gmra.mrb[4].mxu0 %vm748_vm2, %v741_v26 }
 0x23e   : > { %v735_v32 = vadd.f32 1e-06, %v731_v30  ;;  %1385 = vmatprep.mubr.msk.f32.mxu0 %vm748_vm2, %v742_v29 }
 0x23f   : > { %v734_v34 = vadd.f32 1e-06, %v730_v31  ;;  %v1006_v31 = vld [vmem:[#allocation12 + $0x38] sm:$0xff] }
 0x240   : > { %1581 = vrsqrt.f32 %v735_v32 }
 0x241   : > { %1583 = vrsqrt.f32 %v734_v34  ;;  %1386 = vmatmul.mubr.msk.f32.gmra.mrb[6].mxu0 %vm748_vm2, %v743_v33 }
 0x242   : > { %1388 = vmatprep.mubr.msk.f32.mxu0 %vm748_vm2, %v744_v35 }
 0x245   : > { %1389 = vmatmul.mubr.msk.f32.gmra.mrb[8].mxu0 %vm748_vm2, %v745_v36 }
 0x246   : > { %v1578_v38 = vpop.eup %1577  ;;  %1391 = vmatprep.mubr.msk.f32.mxu0 %vm748_vm2, %v746_v37 }
 0x247   : > { %v1580_v40 = vpop.eup %1579 }
 0x248   : > { %v1454_v41 = vpack.c.bf16 %v1578_v38, %v1580_v40 }
 0x249   : > { %1392 = vmatmul.mubr.msk.f32.gmra.mrb[10].mxu0 %vm748_vm2, %v747_v39 }
 0x24a   : > { %v1582_v42 = vpop.eup %1581  ;;  %1455 = vmatprep.subr.bf16.mxu1 %v1454_v41 }
 0x24b   : > { %v1584_v43 = vpop.eup %1583  ;;  %1457 = vmatpush3.bf16.msra.mxu1 %v1454_v41 }
 0x24c   : > { %v1458_v44 = vpack.c.bf16 %v1582_v42, %v1584_v43 }
 0x24e   : > { %1459 = vmatprep.subr.bf16.mxu1 %v1458_v44 }
 0x24f   : > { %1461 = vmatpush3.bf16.msra.mxu1 %v1458_v44 }
 0x252   : > { %1403 = vmatmul.mubr.msk.f32.vlgmr.msra.gmra.mrb[4].mxu1 %vm748_vm2, %v741_v26 }
 0x253   : > { %1405 = vmatprep.mubr.msk.f32.mxu1 %vm748_vm2, %v742_v29 }
 0x256   : > { %1406 = vmatmul.mubr.msk.f32.gmra.mrb[6].mxu1 %vm748_vm2, %v743_v33  ;;  %v1005_v33 = vld [vmem:[#allocation12 + $0x30] sm:$0xff] }
 0x257   : > { %1408 = vmatprep.mubr.msk.f32.mxu1 %vm748_vm2, %v744_v35 }
 0x25a   : > { %1409 = vmatmul.mubr.msk.f32.gmra.mrb[8].mxu1 %vm748_vm2, %v745_v36 }
 0x25b   : > { %1411 = vmatprep.mubr.msk.f32.mxu1 %vm748_vm2, %v746_v37 }
 0x25e   : > { %1412 = vmatmul.mubr.msk.f32.gmra.mrb[10].mxu1 %vm748_vm2, %v747_v39 }
 0x310   : > { %v1384_v45 = vpop.f32.mrb[4].mxu0 }
 0x311   : > { %v839_v46 = vpop.f32.mrb[5].mxu0 }
 0x314   : > { %v1387_v47 = vpop.f32.mrb[6].mxu0 }
 0x315   : > { %v849_v48 = vpop.f32.mrb[7].mxu0 }
 0x318   : > { %v1390_v49 = vpop.f32.mrb[8].mxu0 }
 0x319   : > { %v859_v50 = vpop.f32.mrb[9].mxu0 }
 0x31c   : > { %v2229_v51 = vpop.f32.mrb[10].mxu0 }
 0x31d   : > { %v2231_v52 = vpop.f32.mrb[11].mxu0 }
 0x325   : > { %v1404_v55 = vpop.f32.mrb[4].mxu1 }
 0x326   : > { %v992_v56 = vmul.f32 %v1404_v55, %v984_v53  ;;  %v944_v57 = vpop.f32.mrb[5].mxu1 }
 0x327   : > { %v991_v58 = vmul.f32 %v983_v54, %v944_v57 }
 0x328   : > { %1024 = vst.msk [vmem:[%s2234_s7 + $0x8] sm:$0xff] %vm360_vm0, %v992_v56  ;;  %v1008_v61 = vmul.f32 %v1384_v45, %v992_v56 }
 0x329   : > { %1023 = vst.msk [vmem:[%s2234_s7] sm:$0xff] %vm360_vm0, %v991_v58  ;;  %v1007_v0 = vmul.f32 %v991_v58, %v839_v46  ;;  %v1407_v1 = vpop.f32.mrb[6].mxu1 }
 0x32a   : > { %v1016_v2 = vsub.f32 %v1000_v59, %v1008_v61  ;;  %v994_v3 = vmul.f32 %v1407_v1, %v986_v60  ;;  %v954_v4 = vpop.f32.mrb[7].mxu1 }
 0x32b   : > { %v1015_v5 = vsub.f32 %v999_v62, %v1007_v0  ;;  %v993_v6 = vmul.f32 %v985_v63, %v954_v4 }
 0x32c   : > { %1032 = vst.msk [vmem:[%s2240_s9 + $0x8] sm:$0xff] %vm360_vm0, %v1016_v2  ;;  %1026 = vst.msk [vmem:[%s2234_s7 + $0x18] sm:$0xff] %vm360_vm0, %v994_v3  ;;  %v1010_v9 = vmul.f32 %v1387_v47, %v994_v3 }
 0x32d   : > { %1031 = vst.msk [vmem:[%s2240_s9] sm:$0xff] %vm360_vm0, %v1015_v5  ;;  %1025 = vst.msk [vmem:[%s2234_s7 + $0x10] sm:$0xff] %vm360_vm0, %v993_v6  ;;  %v1009_v12 = vmul.f32 %v993_v6, %v849_v48  ;;  %v1410_v13 = vpop.f32.mrb[8].mxu1 }
 0x32e   : > { %v1018_v14 = vsub.f32 %v1002_v7, %v1010_v9  ;;  %v996_v15 = vmul.f32 %v1410_v13, %v988_v8  ;;  %v964_v16 = vpop.f32.mrb[9].mxu1 }
 0x32f   : > { %v1017_v17 = vsub.f32 %v1001_v10, %v1009_v12  ;;  %v995_v18 = vmul.f32 %v987_v11, %v964_v16 }
 0x330   : > { %1034 = vst.msk [vmem:[%s2240_s9 + $0x18] sm:$0xff] %vm360_vm0, %v1018_v14  ;;  %1028 = vst.msk [vmem:[%s2234_s7 + $0x28] sm:$0xff] %vm360_vm0, %v996_v15  ;;  %v1012_v21 = vmul.f32 %v1390_v49, %v996_v15 }
 0x331   : > { %1033 = vst.msk [vmem:[%s2240_s9 + $0x10] sm:$0xff] %vm360_vm0, %v1017_v17  ;;  %1027 = vst.msk [vmem:[%s2234_s7 + $0x20] sm:$0xff] %vm360_vm0, %v995_v18  ;;  %v1011_v24 = vmul.f32 %v995_v18, %v859_v50  ;;  %v1413_v25 = vpop.f32.mrb[10].mxu1 }
 0x332   : > { %v1020_v26 = vsub.f32 %v1004_v19, %v1012_v21  ;;  %v998_v27 = vmul.f32 %v1413_v25, %v990_v20  ;;  %v974_v28 = vpop.f32.mrb[11].mxu1 }
 0x333   : > { %v1019_v29 = vsub.f32 %v1003_v22, %v1011_v24  ;;  %v997_v30 = vmul.f32 %v989_v23, %v974_v28 }
 0x334   : > { %1036 = vst.msk [vmem:[%s2240_s9 + $0x28] sm:$0xff] %vm360_vm0, %v1020_v26  ;;  %1030 = vst.msk [vmem:[%s2234_s7 + $0x38] sm:$0xff] %vm360_vm0, %v998_v27  ;;  %v1014_v32 = vmul.f32 %v2229_v51, %v998_v27 }
 0x335   : > { %1035 = vst.msk [vmem:[%s2240_s9 + $0x20] sm:$0xff] %vm360_vm0, %v1019_v29  ;;  %1029 = vst.msk [vmem:[%s2234_s7 + $0x30] sm:$0xff] %vm360_vm0, %v997_v30  ;;  %v1013_v34 = vmul.f32 %v997_v30, %v2231_v52 }
 0x336   : > { %v1022_v35 = vsub.f32 %v1006_v31, %v1014_v32 }
 0x337   : > { %1740 = shalt.err (!%p1737_p0)
}
 0x338   : > { %s1741_s17 = scalar_lea.hbm %s2265_s20, 1024  ;;  %s1745_s7 = scalar_lea.hbm %s2377_s5, 2048 }
 0x339   : > { %p1742_p4 = scmp.ne.s32.totalorder %s2265_s20, %s1741_s17  ;;  %p1746_p12 = scmp.lt.u32.totalorder %s2265_s20, %s2377_s5 }
 0x33a   : > { %p1747_p1 = scmp.lt.u32.totalorder %s1745_s7, %s1741_s17  ;;  %p1749_p8 = scmp.lt.u32.totalorder %s1741_s17, %s2265_s20 }
 0x33b   : > { %p1743_p13 = pnand %p1742_p4, %p2084_p5 }
 0x33c   : > { %p1748_p11 = por %p1747_p1, %p1746_p12 }
 0x33d   : > { %p1744_p2 = pneg %p1743_p13 }
 0x33e   : > { %p1750_p6 = por %p1749_p8, %p1748_p11 }
 0x340   : > { %p1751_p10 = pnand %p1750_p6, %p1744_p2 }
 0x342   : > { %1754 = shalt.err (!%p1751_p10)
}
 0x343   : > { %s1862_s30 = smov 128   ;;  %s1863_s14 = smov 8   ;;  %v1021_v36 = vsub.f32 %v1005_v33, %v1013_v34  ;;  %1038 = vst.msk [vmem:[%s2240_s9 + $0x38] sm:$0xff] %vm360_vm0, %v1022_v35 }
 0x344   : > { %1480 = dma.vmem_to_hbm [thread:$0]  (%p2084_p5), %s2267_s15, 1024, %s2265_s20, %s1040_s10, %s1862_s30, %s1862_s30, %s1863_s14  }
 0x345   : > { %s2402_s17 = sld [smem:[#allocation23_spill]]  ;;  %1037 = vst.msk [vmem:[%s2240_s9 + $0x30] sm:$0xff] %vm360_vm0, %v1021_v36  ;;  %s1045_s29 = scalar_lea.sflag [#allocation15], %s2139_s12 }
 0x346   : > { %s1755_s7 = scalar_lea.vmem %s2316_s27, 1024  ;;  %s1864_s24 = smov [#allocation14]  }
 0x347   : > { %p1756_p3 = scmp.ne.s32.totalorder %s2316_s27, %s1755_s7  ;;  %s1759_s15 = sshll.u32 %s1864_s24, 4  ;;  %s1760_s15 = int_to_ptr.vmem [resolvable:$false] %s1759_s15 }
 0x348   : > { %p1762_p0 = scmp.lt.s32.totalorder %s2316_s27, %s1760_s15 }
 0x349   : > { %p1757_p7 = pnand %p1756_p3, %p2084_p5 }
 0x34b   : > { %s2312_s18 = scalar_lea.hbm %s2402_s17, %s1280_s13  ;;  %p1758_p9 = pneg %p1757_p7 }
 0x34c   : > { %s1761_s13 = scalar_lea.vmem %s1760_s15, 2048 }
 0x34d   : > { %p1763_p4 = scmp.lt.s32.totalorder %s1761_s13, %s1755_s7 }
 0x34f   : > { %p1764_p13 = por %p1763_p4, %p1762_p0 }
 0x351   : > { %p1765_p2 = pnand %p1764_p13, %p1758_p9 }
 0x353   : > { %1768 = shalt.err (!%p1765_p2)
}
 0x354   : > { %s1769_s9 = scalar_lea.hbm %s2312_s18, 1024  ;;  %s1773_s11 = scalar_lea.hbm %s2402_s17, 2048 }
 0x355   : > { %p1770_p12 = scmp.ne.s32.totalorder %s2312_s18, %s1769_s9  ;;  %p1774_p8 = scmp.lt.u32.totalorder %s2312_s18, %s2402_s17 }
 0x356   : > { %p1775_p6 = scmp.lt.u32.totalorder %s1773_s11, %s1769_s9  ;;  %p1777_p3 = scmp.lt.u32.totalorder %s1769_s9, %s2312_s18 }
 0x357   : > { %p1771_p1 = pnand %p1770_p12, %p2084_p5 }
 0x358   : > { %p1776_p10 = por %p1775_p6, %p1774_p8 }
 0x359   : > { %p1772_p11 = pneg %p1771_p1 }
 0x35a   : > { %p1778_p7 = por %p1777_p3, %p1776_p10 }
 0x35c   : > { %p1779_p9 = pnand %p1778_p7, %p1772_p11 }
 0x35e   : > { %1782 = shalt.err (!%p1779_p9)
}
 0x35f   : > { %1481 = dma.vmem_to_hbm [thread:$0]  (%p2084_p5), %s2316_s27, 1024, %s2312_s18, %s1045_s29, %s1862_s30, %s1862_s30, %s1863_s14  }
 0x360 PF: > { %s2403_s19 = sld [smem:[#allocation21_spill]]  ;;  %s2404_s7 = sld [smem:[#allocation22_spill]] }
 0x361   : > { %p2406_p4 = scmp.ge.s32.totalorder %s1849_s26, 2 }
 0x366   : > { %s1089_s24 = sand.u32 1, %s2403_s19   ;;  %p2405_p0 = scmp.ne.s32.totalorder %s2404_s7, 0 }
 0x367   : > { %s1090_s15 = scalar_lea.sflag [#allocation6], %s1089_s24 }
 0x368   : > { %p1502_p13 = pnand %p2406_p4, %p2405_p0 }
 0x36a   : > { %1820 = dma.done.wait (!%p1502_p13), %s1090_s15, 1024  }
 0x36b   : > { %1822 = vsyncadd (!%p1502_p13), %s1090_s15, 4294966272  ;;  %s1099_s21 = scalar_lea.sflag [#allocation15], %s1089_s24 }
 0x36c   : > { %1824 = dma.done.wait (!%p1502_p13), %s1099_s21, 1024  }
 0x36d   : > { %1826 = vsyncadd (!%p1502_p13), %s1099_s21, 4294966272  ;;  %s28_s26 = sadd.s32 1, %s1849_s26   ;;  %s2407_s21 = smov %s1833_s22 }
 0x36e   : > { %p25_p2 = scmp.ge.s32.totalorder %s28_s26, 4   ;;  %s2408_s22 = smov %s1837_s23 }
 0x36f   : > { %s2409_s23 = smov %s2093_s8  ;;  %s2410_s24 = smov %s1845_s25 }
 0x370   : > { %s2411_s25 = smov %s2413_s28  ;;  %27 = sbr.rel (!%p25_p2) target bundleno = 12 (0xc), region = 126 }
 0x377   :  { %1104 = vsyncpa [#allocation5], 1 }
 0x378   :  { %1106 = vsyncpa [#allocation5 + $0x1], 1 }
 0x379   :  { %1107 = vsyncpa [#allocation8], 1 }
 0x37a   :  { %1108 = vsyncpa [#allocation11], 1 }
 0x37b   :  { %1109 = vsyncpa [#allocation6], 1 }
 0x37c   :  { %1111 = vsyncpa [#allocation6 + $0x1], 1 }
 0x37d   :  { %1112 = vsyncpa [#allocation15], 1 }
 0x37e   :  { %1114 = vsyncpa [#allocation15 + $0x1], 1 }

</bundles_post_ra>
